<compile_context>
chip_gen: v7x
topology: tpu7x:2x2x1
jax: 0.10.0
libtpu: 0.0.40
codegen_flags: <defaults>
</compile_context>

<pallas_src>
import functools

import jax
import jax.numpy as jnp
from jax.experimental import pallas as pl
from jax.experimental.pallas import tpu as pltpu


def _round_up(x, m):
    return ((x + m - 1) // m) * m


def _tree_lstm_kernel(arity, d, *refs):
    """Fused TreeLSTM cell for one batch tile.

    refs layout (inputs then outputs):
      h_0..h_{A-1}   : (TB, d_k)        children hidden states
      c_0..c_{A-1}   : (TB, d)          children cell states
      w_0..w_{A-1}   : (d_k, (3+A)*d)   per-child slab of fused gate weights
      b_all          : (1, (3+A)*d)     fused gate bias
      h_out, c_out   : (TB, d)
    Fused gate order along the output dim: [i | o | u | f_0 .. f_{A-1}].
    """
    h_refs = refs[0:arity]
    c_refs = refs[arity:2 * arity]
    w_refs = refs[2 * arity:3 * arity]
    b_ref = refs[3 * arity]
    h_out_ref = refs[3 * arity + 1]
    c_out_ref = refs[3 * arity + 2]

    # One fused projection per child, accumulated in f32 on the MXU.
    acc = jnp.dot(h_refs[0][...], w_refs[0][...],
                  preferred_element_type=jnp.float32)
    for k in range(1, arity):  # arity is a small static constant
        acc = acc + jnp.dot(h_refs[k][...], w_refs[k][...],
                            preferred_element_type=jnp.float32)
    acc = acc + b_ref[...].astype(jnp.float32)

    # Static lane slices of the fused activation -> individual gates.
    i_j = jax.nn.sigmoid(acc[:, 0:d])
    o_j = jax.nn.sigmoid(acc[:, d:2 * d])
    u_j = jnp.tanh(acc[:, 2 * d:3 * d])

    f_sum = jnp.zeros_like(i_j)
    for k in range(arity):
        f_k = jax.nn.sigmoid(acc[:, (3 + k) * d:(4 + k) * d])
        f_sum = f_sum + f_k * c_refs[k][...].astype(jnp.float32)

    c_j = i_j * u_j + f_sum
    h_j = o_j * jnp.tanh(c_j)

    h_out_ref[...] = h_j.astype(h_out_ref.dtype)
    c_out_ref[...] = c_j.astype(c_out_ref.dtype)


def tree_lstm_cell_wt(list_h_mat, list_c_mat, params, *,
                      tile_b=None, matmul_dtype=None):
    """Pallas-backed forward of TreeLSTMCellWt.

    list_h_mat: list (len=arity) of (B, d_k) arrays (sum d_k == self.latent_dim)
    list_c_mat: list (len=arity) of (B, latent_dim) arrays
    params: dict with wi, bi, wo, bo, wu, bu  (weights pre-transposed to
            (d_in, latent_dim), biases (1, latent_dim)) and
            wf: (arity, d_in, latent_dim), bf: (arity, 1, latent_dim)
    matmul_dtype: optional (e.g. jnp.bfloat16) cast of h / weights for the MXU;
                  accumulation and elementwise gate math stay f32.
    """
    arity = len(list_h_mat)
    assert len(list_c_mat) == arity

    d = params["wi"].shape[1]                       # latent_dim (gate width)
    child_dims = [int(h.shape[-1]) for h in list_h_mat]
    d_in = sum(child_dims)
    assert params["wi"].shape[0] == d_in
    G = 3 + arity                                   # i, o, u, f_0..f_{A-1}

    B = int(list_h_mat[0].shape[0])
    out_dtype = list_h_mat[0].dtype

    # ---- pack weights: fuse gates along the output dim, split per child along K.
    w_fused = jnp.concatenate(
        [params["wi"], params["wo"], params["wu"]]
        + [params["wf"][k] for k in range(arity)], axis=1)          # (d_in, G*d)
    b_fused = jnp.concatenate(
        [params["bi"], params["bo"], params["bu"]]
        + [params["bf"][k] for k in range(arity)], axis=1)          # (1, G*d)

    w_chunks = []
    off = 0
    for dk in child_dims:
        w_chunks.append(w_fused[off:off + dk, :])
        off += dk

    if matmul_dtype is not None:
        w_chunks = [w.astype(matmul_dtype) for w in w_chunks]
        list_h_mat = [h.astype(matmul_dtype) for h in list_h_mat]

    # ---- batch tile selection (multiple of 8; >=2 grid steps for big batches).
    if tile_b is None:
        b8 = _round_up(B, 8)
        if b8 <= 512:
            tile_b = b8
        else:
            tile_b = min(1024, _round_up((b8 + 1) // 2, 8))
    tile_b = _round_up(int(tile_b), 8)

    B_pad = _round_up(B, tile_b)
    if B_pad != B:
        pad = B_pad - B
        list_h_mat = [jnp.pad(h, ((0, pad), (0, 0))) for h in list_h_mat]
        list_c_mat = [jnp.pad(c, ((0, pad), (0, 0))) for c in list_c_mat]

    grid = (B_pad // tile_b,)

    in_specs = (
        [pl.BlockSpec((tile_b, dk), lambda b: (b, 0)) for dk in child_dims] +   # h_k
        [pl.BlockSpec((tile_b, d), lambda b: (b, 0)) for _ in range(arity)] +   # c_k
        [pl.BlockSpec((dk, G * d), lambda b: (0, 0)) for dk in child_dims] +    # w_k (grid-invariant)
        [pl.BlockSpec((1, G * d), lambda b: (0, 0))]                            # bias (grid-invariant)
    )
    out_specs = [pl.BlockSpec((tile_b, d), lambda b: (b, 0)),
                 pl.BlockSpec((tile_b, d), lambda b: (b, 0))]

    kernel = functools.partial(_tree_lstm_kernel, arity, d)

    # Advisory cost estimate for the XLA scheduler.
    flops = 2 * B_pad * d_in * G * d + 10 * B_pad * d
    transcendentals = B_pad * d * (G + 1)
    bytes_accessed = 4 * (B_pad * (d_in + (arity + 2) * d) + (d_in + 1) * G * d)

    h_j, c_j = pl.pallas_call(
        kernel,
        out_shape=(jax.ShapeDtypeStruct((B_pad, d), out_dtype),
                   jax.ShapeDtypeStruct((B_pad, d), out_dtype)),
        grid_spec=pltpu.PrefetchScalarGridSpec(
            num_scalar_prefetch=0,
            grid=grid,
            in_specs=in_specs,
            out_specs=out_specs,
        ),
        compiler_params=pltpu.CompilerParams(
            dimension_semantics=("parallel",)),
        cost_estimate=pl.CostEstimate(flops=flops,
                                      transcendentals=transcendentals,
                                      bytes_accessed=bytes_accessed),
    )(*list_h_mat, *list_c_mat, *w_chunks, b_fused)

    if B_pad != B:
        h_j = h_j[:B]
        c_j = c_j[:B]
    return h_j, c_j


def binary_tree_lstm_cell_wt(lch_state, rch_state, params, **kw):
    """BinaryTreeLSTMCellWt.forward: states are (h, c) tuples."""
    list_h_mat, list_c_mat = zip(lch_state, rch_state)
    return tree_lstm_cell_wt(list(list_h_mat), list(list_c_mat), params, **kw)


# ------------------------------ test harness ------------------------------

def _init_linear(key, d_in, d_out):
    """Deterministic init mimicking torch.nn.Linear defaults.
    Weight is pre-transposed to (d_in, d_out) so the kernel does x @ W."""
    kw, kb = jax.random.split(key)
    bound = 1.0 / jnp.sqrt(jnp.float32(d_in))
    w = jax.random.uniform(kw, (d_in, d_out), jnp.float32, -bound, bound)
    b = jax.random.uniform(kb, (1, d_out), jnp.float32, -bound, bound)
    return w, b


def _reference(list_h_mat, list_c_mat, params):
    """Pure-JAX reference mirroring the PyTorch module (unfused path)."""
    h_cat = jnp.concatenate(list_h_mat, axis=-1)
    i_j = jax.nn.sigmoid(h_cat @ params["wi"] + params["bi"])
    o_j = jax.nn.sigmoid(h_cat @ params["wo"] + params["bo"])
    u_j = jnp.tanh(h_cat @ params["wu"] + params["bu"])
    f_sum = 0.0
    for k, c_k in enumerate(list_c_mat):
        f_k = jax.nn.sigmoid(h_cat @ params["wf"][k] + params["bf"][k])
        f_sum = f_sum + f_k * c_k
    c_j = i_j * u_j + f_sum
    h_j = o_j * jnp.tanh(c_j)
    return h_j, c_j


if __name__ == "__main__":
    # TODO(synk): use_mlp=True (2-layer MLP gates) path is not implemented;
    # this kernel covers the default nn.Linear gate path of the module.
    arity = 2                     # BinaryTreeLSTMCellWt
    latent_dim = 32
    d_in = arity * latent_dim     # default latent_dim_wt=None path

    key = jax.random.PRNGKey(0)
    pkeys = jax.random.split(key, 3 + arity)
    wi, bi = _init_linear(pkeys[0], d_in, latent_dim)
    wo, bo = _init_linear(pkeys[1], d_in, latent_dim)
    wu, bu = _init_linear(pkeys[2], d_in, latent_dim)
    wf_list, bf_list = [], []
    for k in range(arity):
        wf_k, bf_k = _init_linear(pkeys[3 + k], d_in, latent_dim)
        wf_list.append(wf_k)
        bf_list.append(bf_k)
    params = dict(
        wi=wi, bi=bi, wo=wo, bo=bo, wu=wu, bu=bu,
        wf=jnp.stack(wf_list, axis=0),          # (arity, d_in, latent_dim)
        bf=jnp.stack(bf_list, axis=0),          # (arity, 1, latent_dim)
    )

    last_h = last_c = None
    for batch in (8, 37):        # 37 exercises the padding / non-multiple path
        in_keys = jax.random.split(jax.random.PRNGKey(batch), 2 * arity)
        list_h = [jax.random.normal(in_keys[k], (batch, latent_dim), jnp.float32)
                  for k in range(arity)]
        list_c = [jax.random.normal(in_keys[arity + k], (batch, latent_dim), jnp.float32)
                  for k in range(arity)]

        h_j, c_j = tree_lstm_cell_wt(list_h, list_c, params)
        jax.block_until_ready((h_j, c_j))

        h_ref, c_ref = _reference(list_h, list_c, params)
        assert h_j.shape == h_ref.shape and c_j.shape == c_ref.shape
        assert jnp.allclose(h_j, h_ref, atol=1e-5, rtol=1e-5)
        assert jnp.allclose(c_j, c_ref, atol=1e-5, rtol=1e-5)
        last_h, last_c, last_hlist, last_clist = h_j, c_j, list_h, list_c

    # BinaryTreeLSTMCellWt.forward signature: states are (h, c) tuples.
    lch_state = (last_hlist[0], last_clist[0])
    rch_state = (last_hlist[1], last_clist[1])
    h_b, c_b = binary_tree_lstm_cell_wt(lch_state, rch_state, params)
    jax.block_until_ready((h_b, c_b))
    assert jnp.allclose(h_b, last_h, atol=1e-6)
    assert jnp.allclose(c_b, last_c, atol=1e-6)

    print("KERNEL_OK")
</pallas_src>

<mosaic_0001>
module attributes {stable_mosaic.version = 11 : i64} {
  func.func @_tree_lstm_kernel(%arg0: i32, %arg1: memref<8x32xf32, #tpu.memory_space<vmem>>, %arg2: memref<8x32xf32, #tpu.memory_space<vmem>>, %arg3: memref<8x32xf32, #tpu.memory_space<vmem>>, %arg4: memref<8x32xf32, #tpu.memory_space<vmem>>, %arg5: memref<32x160xf32, #tpu.memory_space<vmem>>, %arg6: memref<32x160xf32, #tpu.memory_space<vmem>>, %arg7: memref<1x160xf32, #tpu.memory_space<vmem>>, %arg8: memref<8x32xf32, #tpu.memory_space<vmem>>, %arg9: memref<8x32xf32, #tpu.memory_space<vmem>>) attributes {dimension_semantics = [#tpu.dimension_semantics<parallel>], iteration_bounds = array<i64: 1>, scalar_prefetch = 0 : i64, scratch_operands = 0 : i64, tpu.core_type = #tpu.core_type<tc>, window_params = [{transform_indices = @transform_0, window_bounds = array<i64: 8, 32>}, {transform_indices = @transform_1, window_bounds = array<i64: 8, 32>}, {transform_indices = @transform_2, window_bounds = array<i64: 8, 32>}, {transform_indices = @transform_3, window_bounds = array<i64: 8, 32>}, {pipeline_mode = #tpu.pipeline_mode<synchronous>, transform_indices = @transform_4, window_bounds = array<i64: 32, 160>}, {pipeline_mode = #tpu.pipeline_mode<synchronous>, transform_indices = @transform_5, window_bounds = array<i64: 32, 160>}, {pipeline_mode = #tpu.pipeline_mode<synchronous>, transform_indices = @transform_6, window_bounds = array<i64: 1, 160>}, {transform_indices = @transform_7, window_bounds = array<i64: 8, 32>}, {transform_indices = @transform_8, window_bounds = array<i64: 8, 32>}]} {
    %c0 = arith.constant 0 : index
    %c0_0 = arith.constant 0 : index
    %0 = vector.load %arg1[%c0, %c0_0] : memref<8x32xf32, #tpu.memory_space<vmem>>, vector<8x32xf32>
    %c0_1 = arith.constant 0 : index
    %c0_2 = arith.constant 0 : index
    %1 = vector.load %arg5[%c0_1, %c0_2] : memref<32x160xf32, #tpu.memory_space<vmem>>, vector<32x160xf32>
    %cst = arith.constant dense<0.000000e+00> : vector<8x160xf32>
    %2 = tpu.matmul %0, %1, %cst {dimension_numbers = #tpu.dot_dimension_numbers<[1], [0], [0], [1], [0, 0, 1, 1], [], []>} : vector<8x32xf32>, vector<32x160xf32>, vector<8x160xf32> -> vector<8x160xf32>
    %c0_3 = arith.constant 0 : index
    %c0_4 = arith.constant 0 : index
    %3 = vector.load %arg2[%c0_3, %c0_4] : memref<8x32xf32, #tpu.memory_space<vmem>>, vector<8x32xf32>
    %c0_5 = arith.constant 0 : index
    %c0_6 = arith.constant 0 : index
    %4 = vector.load %arg6[%c0_5, %c0_6] : memref<32x160xf32, #tpu.memory_space<vmem>>, vector<32x160xf32>
    %cst_7 = arith.constant dense<0.000000e+00> : vector<8x160xf32>
    %5 = tpu.matmul %3, %4, %cst_7 {dimension_numbers = #tpu.dot_dimension_numbers<[1], [0], [0], [1], [0, 0, 1, 1], [], []>} : vector<8x32xf32>, vector<32x160xf32>, vector<8x160xf32> -> vector<8x160xf32>
    %6 = arith.addf %2, %5 : vector<8x160xf32>
    %c0_8 = arith.constant 0 : index
    %c0_9 = arith.constant 0 : index
    %7 = vector.load %arg7[%c0_8, %c0_9] : memref<1x160xf32, #tpu.memory_space<vmem>>, vector<1x160xf32>
    %8 = vector.broadcast %7 : vector<1x160xf32> to vector<8x160xf32>
    %9 = arith.addf %6, %8 : vector<8x160xf32>
    %10 = vector.extract_strided_slice %9 {offsets = [0, 0], sizes = [8, 32], strides = [1, 1]} : vector<8x160xf32> to vector<8x32xf32>
    %11 = arith.negf %10 : vector<8x32xf32>
    %12 = math.exp %11 : vector<8x32xf32>
    %cst_10 = arith.constant 1.000000e+00 : f32
    %13 = vector.broadcast %cst_10 : f32 to vector<8x32xf32>
    %14 = arith.addf %13, %12 : vector<8x32xf32>
    %15 = arith.divf %13, %14 : vector<8x32xf32>
    %16 = vector.extract_strided_slice %9 {offsets = [0, 32], sizes = [8, 32], strides = [1, 1]} : vector<8x160xf32> to vector<8x32xf32>
    %17 = arith.negf %16 : vector<8x32xf32>
    %18 = math.exp %17 : vector<8x32xf32>
    %cst_11 = arith.constant 1.000000e+00 : f32
    %19 = vector.broadcast %cst_11 : f32 to vector<8x32xf32>
    %20 = arith.addf %19, %18 : vector<8x32xf32>
    %21 = arith.divf %19, %20 : vector<8x32xf32>
    %22 = vector.extract_strided_slice %9 {offsets = [0, 64], sizes = [8, 32], strides = [1, 1]} : vector<8x160xf32> to vector<8x32xf32>
    %23 = math.tanh %22 : vector<8x32xf32>
    %cst_12 = arith.constant 0.000000e+00 : f32
    %24 = vector.broadcast %cst_12 : f32 to vector<8x32xf32>
    %25 = vector.extract_strided_slice %9 {offsets = [0, 96], sizes = [8, 32], strides = [1, 1]} : vector<8x160xf32> to vector<8x32xf32>
    %26 = arith.negf %25 : vector<8x32xf32>
    %27 = math.exp %26 : vector<8x32xf32>
    %cst_13 = arith.constant 1.000000e+00 : f32
    %28 = vector.broadcast %cst_13 : f32 to vector<8x32xf32>
    %29 = arith.addf %28, %27 : vector<8x32xf32>
    %30 = arith.divf %28, %29 : vector<8x32xf32>
    %c0_14 = arith.constant 0 : index
    %c0_15 = arith.constant 0 : index
    %31 = vector.load %arg3[%c0_14, %c0_15] : memref<8x32xf32, #tpu.memory_space<vmem>>, vector<8x32xf32>
    %32 = arith.mulf %30, %31 : vector<8x32xf32>
    %33 = arith.addf %24, %32 : vector<8x32xf32>
    %34 = vector.extract_strided_slice %9 {offsets = [0, 128], sizes = [8, 32], strides = [1, 1]} : vector<8x160xf32> to vector<8x32xf32>
    %35 = arith.negf %34 : vector<8x32xf32>
    %36 = math.exp %35 : vector<8x32xf32>
    %cst_16 = arith.constant 1.000000e+00 : f32
    %37 = vector.broadcast %cst_16 : f32 to vector<8x32xf32>
    %38 = arith.addf %37, %36 : vector<8x32xf32>
    %39 = arith.divf %37, %38 : vector<8x32xf32>
    %c0_17 = arith.constant 0 : index
    %c0_18 = arith.constant 0 : index
    %40 = vector.load %arg4[%c0_17, %c0_18] : memref<8x32xf32, #tpu.memory_space<vmem>>, vector<8x32xf32>
    %41 = arith.mulf %39, %40 : vector<8x32xf32>
    %42 = arith.addf %33, %41 : vector<8x32xf32>
    %43 = arith.mulf %15, %23 : vector<8x32xf32>
    %44 = arith.addf %43, %42 : vector<8x32xf32>
    %45 = math.tanh %44 : vector<8x32xf32>
    %46 = arith.mulf %21, %45 : vector<8x32xf32>
    %c0_19 = arith.constant 0 : index
    %c0_20 = arith.constant 0 : index
    %47 = vector.load %arg8[%c0_19, %c0_20] : memref<8x32xf32, #tpu.memory_space<vmem>>, vector<8x32xf32>
    tpu.vector_store %arg8[%c0_19, %c0_20], %46 {strides = array<i32>} : memref<8x32xf32, #tpu.memory_space<vmem>>, vector<8x32xf32>,
    %c0_21 = arith.constant 0 : index
    %c0_22 = arith.constant 0 : index
    %48 = vector.load %arg9[%c0_21, %c0_22] : memref<8x32xf32, #tpu.memory_space<vmem>>, vector<8x32xf32>
    tpu.vector_store %arg9[%c0_21, %c0_22], %44 {strides = array<i32>} : memref<8x32xf32, #tpu.memory_space<vmem>>, vector<8x32xf32>,
    return
  }
  func.func @transform_0(%arg0: i32) -> (i32, i32) {
    %c0_i32 = arith.constant 0 : i32
    %c0_i32_0 = arith.constant 0 : i32
    return %arg0, %c0_i32 : i32, i32
  }
  func.func @transform_1(%arg0: i32) -> (i32, i32) {
    %c0_i32 = arith.constant 0 : i32
    %c0_i32_0 = arith.constant 0 : i32
    return %arg0, %c0_i32 : i32, i32
  }
  func.func @transform_2(%arg0: i32) -> (i32, i32) {
    %c0_i32 = arith.constant 0 : i32
    %c0_i32_0 = arith.constant 0 : i32
    return %arg0, %c0_i32 : i32, i32
  }
  func.func @transform_3(%arg0: i32) -> (i32, i32) {
    %c0_i32 = arith.constant 0 : i32
    %c0_i32_0 = arith.constant 0 : i32
    return %arg0, %c0_i32 : i32, i32
  }
  func.func @transform_4(%arg0: i32) -> (i32, i32) {
    %c0_i32 = arith.constant 0 : i32
    %c0_i32_0 = arith.constant 0 : i32
    %c0_i32_1 = arith.constant 0 : i32
    return %c0_i32, %c0_i32_0 : i32, i32
  }
  func.func @transform_5(%arg0: i32) -> (i32, i32) {
    %c0_i32 = arith.constant 0 : i32
    %c0_i32_0 = arith.constant 0 : i32
    %c0_i32_1 = arith.constant 0 : i32
    return %c0_i32, %c0_i32_0 : i32, i32
  }
  func.func @transform_6(%arg0: i32) -> (i32, i32) {
    %c0_i32 = arith.constant 0 : i32
    %c0_i32_0 = arith.constant 0 : i32
    %c0_i32_1 = arith.constant 0 : i32
    return %c0_i32, %c0_i32_0 : i32, i32
  }
  func.func @transform_7(%arg0: i32) -> (i32, i32) {
    %c0_i32 = arith.constant 0 : i32
    %c0_i32_0 = arith.constant 0 : i32
    return %arg0, %c0_i32 : i32, i32
  }
  func.func @transform_8(%arg0: i32) -> (i32, i32) {
    %c0_i32 = arith.constant 0 : i32
    %c0_i32_0 = arith.constant 0 : i32
    return %arg0, %c0_i32 : i32, i32
  }
}

</mosaic_0001>

<bundles_post_ra>
// kernel: tpu_custom_call.1
= control target key start
LH: loop header
LB: loop body
LE: loop exit
PB: predicated region body
PF: predicated region fallthrough
CT: control target
= control target key end

     0   :  { %14 = vsyncpa [#allocation3], 0  ;;  %s732_s0 = inlined_call_operand.hbm [shape: f32[8,32], index: 0, kind: input, shape index: {}]   ;;  %s733_s1 = inlined_call_operand.hbm [shape: f32[8,32], index: 1, kind: input, shape index: {}]   ;;  %s734_s2 = inlined_call_operand.hbm [shape: f32[8,32], index: 2, kind: input, shape index: {}]   ;;  %s735_s3 = inlined_call_operand.vmem [shape: f32[8,32], index: 3, kind: input, shape index: {}]   ;;  %s736_s4 = inlined_call_operand.hbm [shape: f32[32,160], index: 4, kind: input, shape index: {}]   ;;  %s737_s5 = inlined_call_operand.hbm [shape: f32[32,160], index: 5, kind: input, shape index: {}]   ;;  %s738_s6 = inlined_call_operand.vmem [shape: f32[1,160], index: 6, kind: input, shape index: {}]   ;;  %s739_s7 = inlined_call_operand.hbm [shape: f32[8,32], index: 7, kind: output, shape index: {0}]   ;;  %s740_s8 = inlined_call_operand.hbm [shape: f32[8,32], index: 8, kind: output, shape index: {1}]  }
   0x1   :  { %15 = vsyncpa [#allocation6], 0 }
   0x2   :  { %16 = vsyncpa [#allocation9], 0 }
   0x3   :  { %17 = vsyncpa [#allocation4], 0 }
   0x4   :  { %18 = vsyncpa [#allocation13], 0  ;;  %s564_s27 = smov [#allocation5]   ;;  %s565_s29 = smov [#allocation8]  }
   0x5   :  { %s35_s28 = sshll.u32 %s564_s27, 4  ;;  %s56_s30 = sshll.u32 %s565_s29, 4  ;;  %s36_s28 = int_to_ptr.vmem [resolvable:$true] %s35_s28  ;;  %s622_s30 = int_to_ptr.vmem [resolvable:$true] %s56_s30 }
   0x6   :  { %s400_s11 = scalar_lea.hbm %s733_s1, 128 }
   0x7   :  { %p401_p0 = scmp.ne.s32.totalorder %s733_s1, %s400_s11  ;;  %p404_p1 = scmp.lt.u32.totalorder %s400_s11, %s733_s1 }
   0x9   :  { %p406_p2 = pnand %p404_p1, %p401_p0 }
   0xb   :  { %409 = shalt.err (!%p406_p2)
}
   0xc   :  { %s410_s16 = scalar_lea.vmem %s36_s28, 128  ;;  %p415_p4 = scmp.lt.s32.totalorder %s36_s28, %s36_s28 }
   0xd   :  { %p411_p3 = scmp.ne.s32.totalorder %s36_s28, %s410_s16  ;;  %p416_p5 = scmp.lt.s32.totalorder %s410_s16, %s410_s16 }
   0xf   :  { %p417_p6 = por %p416_p5, %p415_p4 }
  0x11   :  { %p418_p7 = pnand %p417_p6, %p411_p3 }
  0x13   :  { %421 = shalt.err (!%p418_p7)
}
  0x14   :  { %38 = dma.hbm_to_vmem [thread:$0]  %s733_s1, 128, %s36_s28, [#allocation6]  }
  0x15   :  { %s422_s21 = scalar_lea.hbm %s736_s4, 1024 }
  0x16   :  { %p423_p8 = scmp.ne.s32.totalorder %s736_s4, %s422_s21  ;;  %p426_p9 = scmp.lt.u32.totalorder %s422_s21, %s736_s4 }
  0x18   :  { %p428_p10 = pnand %p426_p9, %p423_p8 }
  0x1a   :  { %431 = shalt.err (!%p428_p10)
}
  0x1b   :  { %s432_s26 = scalar_lea.vmem %s622_s30, 1024  ;;  %p437_p12 = scmp.lt.s32.totalorder %s622_s30, %s622_s30 }
  0x1c   :  { %p433_p11 = scmp.ne.s32.totalorder %s622_s30, %s432_s26  ;;  %p438_p13 = scmp.lt.s32.totalorder %s432_s26, %s432_s26 }
  0x1e   :  { %p439_p0 = por %p438_p13, %p437_p12 }
  0x20   :  { %p440_p1 = pnand %p439_p0, %p433_p11 }
  0x22   :  { %443 = shalt.err (!%p440_p1)
}
  0x23   :  { %s566_s1 = smov 256   ;;  %s567_s27 = smov 16  }
  0x24   :  { %62 = dma.hbm_to_vmem [thread:$0]  %s736_s4, 1024, %s622_s30, [#allocation9], %s566_s1, %s566_s1, %s567_s27  }
  0x25   :  { %s568_s9 = smov [#allocation2]   ;;  %s569_s11 = smov [#allocation7]  }
  0x26   :  { %s25_s10 = sshll.u32 %s568_s9, 4  ;;  %s45_s12 = sshll.u32 %s569_s11, 4  ;;  %s26_s10 = int_to_ptr.vmem [resolvable:$true] %s25_s10  ;;  %s46_s12 = int_to_ptr.vmem [resolvable:$true] %s45_s12 }
  0x27   :  { %s444_s15 = scalar_lea.hbm %s732_s0, 128 }
  0x28   :  { %p445_p2 = scmp.ne.s32.totalorder %s732_s0, %s444_s15  ;;  %p448_p3 = scmp.lt.u32.totalorder %s444_s15, %s732_s0 }
  0x2a   :  { %p450_p4 = pnand %p448_p3, %p445_p2 }
  0x2c   :  { %453 = shalt.err (!%p450_p4)
}
  0x2d   :  { %s454_s4 = scalar_lea.vmem %s26_s10, 128  ;;  %p459_p6 = scmp.lt.s32.totalorder %s26_s10, %s26_s10 }
  0x2e   :  { %p455_p5 = scmp.ne.s32.totalorder %s26_s10, %s454_s4  ;;  %p460_p7 = scmp.lt.s32.totalorder %s454_s4, %s454_s4 }
  0x30   :  { %p461_p8 = por %p460_p7, %p459_p6 }
  0x32   :  { %p462_p9 = pnand %p461_p8, %p455_p5 }
  0x34   :  { %465 = shalt.err (!%p462_p9)
}
  0x35   :  { %28 = dma.hbm_to_vmem [thread:$0]  %s732_s0, 128, %s26_s10, [#allocation3]  }
  0x36   :  { %s466_s23 = scalar_lea.hbm %s734_s2, 128 }
  0x37   :  { %p467_p10 = scmp.ne.s32.totalorder %s734_s2, %s466_s23  ;;  %p470_p11 = scmp.lt.u32.totalorder %s466_s23, %s734_s2 }
  0x39   :  { %p472_p12 = pnand %p470_p11, %p467_p10 }
  0x3b   :  { %475 = shalt.err (!%p472_p12)
}
  0x3c   :  { %s476_s29 = scalar_lea.vmem %s46_s12, 128  ;;  %p481_p0 = scmp.lt.s32.totalorder %s46_s12, %s46_s12 }
  0x3d   :  { %p477_p13 = scmp.ne.s32.totalorder %s46_s12, %s476_s29  ;;  %p482_p1 = scmp.lt.s32.totalorder %s476_s29, %s476_s29 }
  0x3f   :  { %p483_p2 = por %p482_p1, %p481_p0 }
  0x41   :  { %p484_p3 = pnand %p483_p2, %p477_p13 }
  0x43   :  { %487 = shalt.err (!%p484_p3)
}
  0x44   :  { %48 = dma.hbm_to_vmem [thread:$0]  %s734_s2, 128, %s46_s12, [#allocation6]  }
  0x45   :  { %s570_s10 = smov [#allocation10]   ;;  %s488_s15 = scalar_lea.hbm %s737_s5, 1024 }
  0x46   :  { %s68_s11 = sshll.u32 %s570_s10, 4  ;;  %p489_p4 = scmp.ne.s32.totalorder %s737_s5, %s488_s15  ;;  %s69_s11 = int_to_ptr.vmem [resolvable:$true] %s68_s11 }
  0x47   :  { %p492_p5 = scmp.lt.u32.totalorder %s488_s15, %s737_s5 }
  0x49   :  { %p494_p6 = pnand %p492_p5, %p489_p4 }
  0x4b   :  { %497 = shalt.err (!%p494_p6)
}
  0x4c   :  { %s498_s4 = scalar_lea.vmem %s69_s11, 1024  ;;  %p503_p8 = scmp.lt.s32.totalorder %s69_s11, %s69_s11 }
  0x4d   :  { %p499_p7 = scmp.ne.s32.totalorder %s69_s11, %s498_s4  ;;  %p504_p9 = scmp.lt.s32.totalorder %s498_s4, %s498_s4 }
  0x4f   :  { %p505_p10 = por %p504_p9, %p503_p8 }
  0x51   :  { %p506_p11 = pnand %p505_p10, %p499_p7 }
  0x53   :  { %509 = shalt.err (!%p506_p11)
}
  0x54   :  { %74 = dma.hbm_to_vmem [thread:$0]  %s737_s5, 1024, %s69_s11, [#allocation9], %s566_s1, %s566_s1, %s567_s27  }
  0x55   :  { %554 = dma.done.wait [#allocation3], 128  }
  0x56   :  { %555 = vsyncadd [#allocation3], 4294967168 }
  0x57   :  { %556 = dma.done.wait [#allocation6], 256  }
  0x58   :  { %557 = vsyncadd [#allocation6], 4294967040 }
  0x59   :  { %558 = dma.done.wait [#allocation9], 2048  }
  0x5a   :  { %559 = vsyncadd [#allocation9], 4294965248  ;;  %v571_v0 = vmov 0.0   ;;  %v103_v1 = vld [vmem:[#allocation10 + $0x8] sm:$0xff]  ;;  %v105_v2 = vld [vmem:[#allocation10 + $0x18] sm:$0xff]  ;;  %s572_s5 = smov 96   ;;  %v261_v28 = vlaneseq }
  0x5b   :  { %178 = vmatprep.mubr.f32.mxu1 %v571_v0  ;;  %252 = vmatprep.mubr.f32.mxu0 %v571_v0  ;;  %v94_v3 = vld [vmem:[#allocation8 + $0x8] sm:$0xff]  ;;  %v357_v4 = vpack.c.bf16 %v105_v2, %v103_v1  ;;  %v96_v5 = vld [vmem:[#allocation8 + $0x18] sm:$0xff]  ;;  %v102_v6 = vld [vmem:[#allocation10] sm:$0xff]  ;;  %vm110_vm0 = vcmask 261120   ;;  %s573_s30 = smov 64   ;;  %s574_s21 = smov 32  }
  0x5c   :  { %v104_v7 = vld [vmem:[#allocation10 + $0x10] sm:$0xff]  ;;  %v365_v8 = vpack.c.bf16 %v96_v5, %v94_v3  ;;  %v93_v10 = vld [vmem:[#allocation8] sm:$0xff]  ;;  %v107_v12 = vld [vmem:[#allocation10 + $0x28] sm:$0xff]  ;;  %v262_v29 = vshrl.u32 %v261_v28, 7 }
  0x5d   :  { %v359_v9 = vpack.c.bf16 %v104_v7, %v102_v6  ;;  %v95_v11 = vld [vmem:[#allocation8 + $0x10] sm:$0xff]  ;;  %358 = vmatprep.subr.bf16.mxu1 %v357_v4  ;;  %v109_v14 = vld [vmem:[#allocation10 + $0x38] sm:$0xff]  ;;  %v98_v15 = vld [vmem:[#allocation8 + $0x28] sm:$0xff] }
  0x5e   :  { %v367_v13 = vpack.c.bf16 %v95_v11, %v93_v10  ;;  %v100_v16 = vld [vmem:[#allocation8 + $0x38] sm:$0xff]  ;;  %366 = vmatprep.subr.bf16.mxu0 %v365_v8  ;;  %v361_v17 = vpack.c.bf16 %v109_v14, %v107_v12  ;;  %v106_v19 = vld [vmem:[#allocation10 + $0x20] sm:$0xff]  ;;  %v108_v20 = vld [vmem:[#allocation10 + $0x30] sm:$0xff]  ;;  %v263_v30 = vsub.s32 0, %v262_v29  ;;  %v267_v32 = vsub.s32 1, %v262_v29 }
  0x5f   :  { %360 = vmatpush1.bf16.msra.mxu1 %v359_v9  ;;  %v369_v18 = vpack.c.bf16 %v100_v16, %v98_v15  ;;  %v97_v21 = vld [vmem:[#allocation8 + $0x20] sm:$0xff]  ;;  %v363_v22 = vpack.c.bf16 %v108_v20, %v106_v19  ;;  %v99_v23 = vld [vmem:[#allocation8 + $0x30] sm:$0xff]  ;;  %v280_v25 = vld [vmem:[#allocation7] sm:$0xff] }
  0x60   :  { %368 = vmatpush1.bf16.msra.mxu0 %v367_v13  ;;  %362 = vmatprep.subr.bf16.mxu1 %v361_v17  ;;  %v371_v24 = vpack.c.bf16 %v99_v23, %v97_v21  ;;  %v101_v26 = vld [vmem:[#allocation5] sm:$0xff]  ;;  %v92_v27 = vld [vmem:[#allocation2] sm:$0xff] }
  0x61   :  { %370 = vmatprep.subr.bf16.mxu0 %v369_v18  ;;  %282 = vrot.lane.b32.xlu0 %v280_v25, %s572_s5  ;;  %v259_v31 = vld [vmem:[%s738_s6] sm:$0x3] }
  0x62   :  { %v264_v34 = vrot.slane %v259_v31, %v263_v30  ;;  %v268_v37 = vrot.slane %v259_v31, %v267_v32  ;;  %v293_v47 = vld [vmem:[%s735_s3] sm:$0xff]  ;;  %s575_s3 = smov [#allocation12]  }
  0x63   :  { %364 = vmatpush1.bf16.msra.mxu1 %v363_v22  ;;  %s338_s22 = sshll.u32 %s575_s3, 4  ;;  %s339_s22 = int_to_ptr.vmem [resolvable:$true] %s338_s22 }
  0x64   :  { %372 = vmatpush1.bf16.msra.mxu0 %v371_v24  ;;  %s510_s23 = scalar_lea.vmem %s339_s22, 128  ;;  %p515_p13 = scmp.lt.s32.totalorder %s339_s22, %s339_s22 }
  0x65   :  { %p511_p12 = scmp.ne.s32.totalorder %s339_s22, %s510_s23  ;;  %p516_p0 = scmp.lt.s32.totalorder %s510_s23, %s510_s23 }
  0x66   :  { %353 = vmatmul.mubr.msk.f32.vlgmr.msra.gmra.mrb[0].mxu1 %vm110_vm0, %v101_v26 }
  0x67   :  { %354 = vmatmul.mubr.msk.f32.vlgmr.msra.gmra.mrb[0].mxu0 %vm110_vm0, %v92_v27  ;;  %p517_p1 = por %p516_p0, %p515_p13 }
  0x69   :  { %p518_p2 = pnand %p517_p1, %p511_p12 }
  0xd3   :  { %v283_v54 = vpop.permute.xlu0 %282 }
 0x139   :  { %v180_v33 = vpop.f32.mrb[0].mxu1 }
 0x13a   :  { %v254_v35 = vpop.f32.mrb[0].mxu0  ;;  %v182_v36 = vpop.f32.mrb[1].mxu1 }
 0x13b   :  { %v255_v38 = vadd.f32 %v254_v35, %v180_v33  ;;  %v256_v39 = vpop.f32.mrb[1].mxu0 }
 0x13c   :  { %v257_v40 = vadd.f32 %v256_v39, %v182_v36 }
 0x13d   :  { %v271_v41 = vadd.f32 %v264_v34, %v255_v38 }
 0x13e   :  { %v272_v42 = vadd.f32 %v268_v37, %v257_v40 }
 0x13f   :  { %388 = vtanh.f32 %v271_v41  ;;  %v355_v50 = vmul.f32 -1.442695, %v271_v41 }
 0x140   :  { %v356_v43 = vmul.f32 -1.442695, %v272_v42 }
 0x142   :  { %390 = vpow2.f32 %v356_v43 }
 0x149   :  { %v389_v44 = vpop.eup %388 }
 0x14a   :  { %301 = vrot.lane.b32.xlu1 %v389_v44, %s573_s30 }
 0x14c   :  { %v391_v45 = vpop.eup %390 }
 0x14d   :  { %v290_v46 = vadd.f32 1.0, %v391_v45 }
 0x14f   :  { %392 = vrcp.f32 %v290_v46 }
 0x150   :  { %394 = vpow2.f32 %v355_v50 }
 0x159   :  { %v393_v48 = vpop.eup %392 }
 0x15a   :  { %v294_v49 = vmul.f32 %v393_v48, %v293_v47  ;;  %v395_v51 = vpop.eup %394 }
 0x15b   :  { %v276_v52 = vadd.f32 1.0, %v395_v51 }
 0x15c   :  { %296 = vrot.lane.b32.xlu0 %v294_v49, %s572_s5 }
 0x15d   :  { %396 = vrcp.f32 %v276_v52 }
 0x167   :  { %v397_v53 = vpop.eup %396 }
 0x168   :  { %v285_v55 = vmul.f32 %v397_v53, %v283_v54 }
 0x1bc   :  { %v302_v58 = vpop.permute.xlu1 %301 }
 0x1bd   :  { %v304_v59 = vmul.f32 %v397_v53, %v302_v58 }
 0x1ce   :  { %v297_v56 = vpop.permute.xlu0 %296 }
 0x1cf   :  { %v299_v57 = vadd.f32 %v297_v56, %v285_v55 }
 0x1d1   :  { %306 = vrot.lane.b32.xlu1 %v299_v57, %s574_s21 }
 0x243   :  { %v307_v60 = vpop.permute.xlu1 %306 }
 0x244   :  { %v309_v61 = vadd.f32 %v307_v60, %v304_v59 }
 0x246   :  { %398 = vtanh.f32 %v309_v61  ;;  %321 = vst.msk [vmem:[#allocation12] sm:$0xff] %vm110_vm0, %v309_v61 }
 0x250   :  { %v399_v62 = vpop.eup %398 }
 0x251   :  { %312 = vrot.lane.b32.xlu0 %v399_v62, %s574_s21 }
 0x252   :  { %521 = shalt.err (!%p518_p2)
}
 0x253   :  { %s522_s26 = scalar_lea.hbm %s740_s8, 128 }
 0x254   :  { %p523_p3 = scmp.ne.s32.totalorder %s740_s8, %s522_s26  ;;  %p526_p4 = scmp.lt.u32.totalorder %s522_s26, %s740_s8 }
 0x256   :  { %p528_p5 = pnand %p526_p4, %p523_p3 }
 0x258   :  { %531 = shalt.err (!%p528_p5)
}
 0x259   :  { %341 = dma.vmem_to_hbm [thread:$0]  %s339_s22, 128, %s740_s8, [#allocation13]  }
 0x25a   :  { %s576_s13 = smov [#allocation11]  }
 0x25b   :  { %s328_s14 = sshll.u32 %s576_s13, 4  ;;  %s329_s14 = int_to_ptr.vmem [resolvable:$true] %s328_s14 }
 0x25c   :  { %s532_s15 = scalar_lea.vmem %s329_s14, 128  ;;  %p537_p7 = scmp.lt.s32.totalorder %s329_s14, %s329_s14 }
 0x25d   :  { %p533_p6 = scmp.ne.s32.totalorder %s329_s14, %s532_s15  ;;  %p538_p8 = scmp.lt.s32.totalorder %s532_s15, %s532_s15 }
 0x25f   :  { %p539_p9 = por %p538_p8, %p537_p7 }
 0x261   :  { %p540_p10 = pnand %p539_p9, %p533_p6 }
 0x2c3   :  { %v313_v63 = vpop.permute.xlu0 %312 }
 0x2c4   :  { %v315_v0 = vmul.f32 %v397_v53, %v313_v63 }
 0x2c6   :  { %317 = vrot.lane.b32.xlu1 %v315_v0, %s572_s5 }
 0x338   :  { %v318_v1 = vpop.permute.xlu1 %317 }
 0x339   :  { %320 = vst.msk [vmem:[#allocation11] sm:$0xff] %vm110_vm0, %v318_v1 }
 0x33a   :  { %543 = shalt.err (!%p540_p10)
}
 0x33b   :  { %s544_s8 = scalar_lea.hbm %s739_s7, 128 }
 0x33c   :  { %p545_p11 = scmp.ne.s32.totalorder %s739_s7, %s544_s8  ;;  %p548_p12 = scmp.lt.u32.totalorder %s544_s8, %s739_s7 }
 0x33e   :  { %p550_p13 = pnand %p548_p12, %p545_p11 }
 0x340   :  { %553 = shalt.err (!%p550_p13)
}
 0x341   :  { %331 = dma.vmem_to_hbm [thread:$0]  %s329_s14, 128, %s739_s7, [#allocation4]  }
 0x342   :  { %560 = dma.done.wait [#allocation4], 128  }
 0x343   :  { %561 = vsyncadd [#allocation4], 4294967168 }
 0x344   :  { %562 = dma.done.wait [#allocation13], 128  }
 0x345   :  { %563 = vsyncadd [#allocation13], 4294967168 }
 0x346   :  { %348 = vsyncpa [#allocation3], 1 }
 0x347   :  { %349 = vsyncpa [#allocation6], 1 }
 0x348   :  { %350 = vsyncpa [#allocation9], 1 }
 0x349   :  { %351 = vsyncpa [#allocation4], 1 }
 0x34a   :  { %352 = vsyncpa [#allocation13], 1 }

</bundles_post_ra>
